<compile_context>
chip_gen: v5e
topology: v5e:2x2
jax: 0.10.0
libtpu: 0.0.40
codegen_flags: <defaults>
</compile_context>

<pallas_src>
import functools

import jax
import jax.numpy as jnp
from jax import lax
from jax.experimental import pallas as pl
from jax.experimental.pallas import tpu as pltpu


def _round_up(x, m):
    return (x + m - 1) // m * m


def _sdpa_kernel(q_ref, k_ref, v_ref, *rest, scale, lk_valid, lk_pad, has_mask):
    if has_mask:
        mask_ref, ctx_ref, attn_ref = rest
    else:
        ctx_ref, attn_ref = rest

    q = q_ref[0]                      # (TQ, D_p)
    k = k_ref[0]                      # (Lk_p, D_p)
    v = v_ref[0]                      # (Lk_p, Dv_p)

    # Fold the scale into q (cheaper than scaling the (TQ, Lk) score tile).
    if scale:
        q = q * jnp.asarray(scale, q.dtype)

    # scores = q @ k^T expressed via contraction dims (no materialized transpose).
    scores = lax.dot_general(
        q, k,
        dimension_numbers=(((1,), (1,)), ((), ())),
        preferred_element_type=jnp.float32)          # (TQ, Lk_p), f32

    neg_inf = jnp.float32(-jnp.inf)

    # Mask out padded key columns (static: only emitted when padding exists).
    if lk_pad != lk_valid:
        col = lax.broadcasted_iota(jnp.int32, scores.shape, 1)
        scores = jnp.where(col < lk_valid, scores, neg_inf)

    # Optional boolean attn_mask (masked_fill with -inf), passed as int32.
    if has_mask:
        scores = jnp.where(mask_ref[0] != 0, neg_inf, scores)

    # Numerically stable softmax over the key axis (dim=2 of the full tensor).
    m = jnp.max(scores, axis=-1, keepdims=True)
    e = jnp.exp(scores - m)
    denom = jnp.sum(e, axis=-1, keepdims=True)
    attn = e * pl.reciprocal(denom, approx=True)     # (TQ, Lk_p)

    # dropout_rate = 0.0 -> identity (no-op)

    # context = attn @ v
    ctx = jnp.dot(attn.astype(v.dtype), v,
                  preferred_element_type=jnp.float32)  # (TQ, Dv_p)

    ctx_ref[0] = ctx.astype(ctx_ref.dtype)
    attn_ref[0] = attn.astype(attn_ref.dtype)


def scaled_dot_product_attention(q, k, v, scale=None, attn_mask=None):
    """Pallas TPU implementation of ScaledDotProductAttention.forward.

    q: [B, L_q, D], k: [B, L_k, D], v: [B, L_k, D_v]
    attn_mask: optional boolean [B, L_q, L_k]; True entries are masked to -inf.
    Returns (context [B, L_q, D_v], attention [B, L_q, L_k]).
    """
    B, Lq, D = q.shape
    Bk, Lk, Dk = k.shape
    Bv, Lv, Dv = v.shape
    assert B == Bk == Bv and D == Dk and Lk == Lv

    # Lane/sublane friendly padded shapes (last dims multiple of 128, Lq tiles of 8).
    TQ = min(128, _round_up(max(Lq, 1), 8))
    Lq_p = _round_up(Lq, TQ)
    Lk_p = _round_up(Lk, 128)
    D_p = _round_up(D, 128)
    Dv_p = _round_up(Dv, 128)

    q_p = jnp.pad(q, ((0, 0), (0, Lq_p - Lq), (0, D_p - D)))
    k_p = jnp.pad(k, ((0, 0), (0, Lk_p - Lk), (0, D_p - D)))
    v_p = jnp.pad(v, ((0, 0), (0, Lk_p - Lk), (0, Dv_p - Dv)))

    has_mask = attn_mask is not None
    inputs = [q_p, k_p, v_p]
    in_specs = [
        pl.BlockSpec((1, TQ, D_p), lambda b, i: (b, i, 0)),
        # k/v indexed only by the batch axis -> resident across the Lq tiles.
        pl.BlockSpec((1, Lk_p, D_p), lambda b, i: (b, 0, 0)),
        pl.BlockSpec((1, Lk_p, Dv_p), lambda b, i: (b, 0, 0)),
    ]
    if has_mask:
        m_p = jnp.pad(attn_mask.astype(jnp.int32),
                      ((0, 0), (0, Lq_p - Lq), (0, Lk_p - Lk)))
        inputs.append(m_p)
        in_specs.append(pl.BlockSpec((1, TQ, Lk_p), lambda b, i: (b, i, 0)))

    kernel = functools.partial(_sdpa_kernel, scale=scale, lk_valid=Lk,
                               lk_pad=Lk_p, has_mask=has_mask)

    # Rough double-buffered VMEM estimate; raise the scoped limit only if needed.
    itemsize = 4
    est = 2 * itemsize * (TQ * D_p + Lk_p * D_p + Lk_p * Dv_p
                          + TQ * Dv_p + TQ * Lk_p
                          + (TQ * Lk_p if has_mask else 0))
    vmem_limit = None
    if est > 24 * 1024 * 1024:
        vmem_limit = min(int(est * 3 // 2), 48 * 1024 * 1024)

    ctx_p, attn_p = pl.pallas_call(
        kernel,
        out_shape=(
            jax.ShapeDtypeStruct((B, Lq_p, Dv_p), q.dtype),
            jax.ShapeDtypeStruct((B, Lq_p, Lk_p), q.dtype),
        ),
        grid=(B, Lq_p // TQ),
        in_specs=in_specs,
        out_specs=(
            pl.BlockSpec((1, TQ, Dv_p), lambda b, i: (b, i, 0)),
            pl.BlockSpec((1, TQ, Lk_p), lambda b, i: (b, i, 0)),
        ),
        compiler_params=pltpu.CompilerParams(
            dimension_semantics=("parallel", "parallel"),
            vmem_limit_bytes=vmem_limit,
        ),
    )(*inputs)

    # Slice padding back off.
    return ctx_p[:, :Lq, :Dv], attn_p[:, :Lq, :Lk]


def _reference(q, k, v, scale=None, attn_mask=None):
    scores = jnp.einsum("bqd,bkd->bqk", q, k)
    if scale:
        scores = scores * scale
    if attn_mask is not None:
        scores = jnp.where(attn_mask, -jnp.inf, scores)
    attn = jax.nn.softmax(scores, axis=2)
    ctx = jnp.einsum("bqk,bkd->bqd", attn, v)
    return ctx, attn


if __name__ == "__main__":
    key = jax.random.PRNGKey(0)
    kq, kk, kv, km = jax.random.split(key, 4)

    B, Lq, Lk, D, Dv = 2, 8, 8, 32, 32
    q = jax.random.normal(kq, (B, Lq, D), dtype=jnp.float32)
    k = jax.random.normal(kk, (B, Lk, D), dtype=jnp.float32)
    v = jax.random.normal(kv, (B, Lk, Dv), dtype=jnp.float32)
    scale = 1.0 / (D ** 0.5)

    # Path 1: attn_mask=None (the module's default path).
    ctx, attn = scaled_dot_product_attention(q, k, v, scale=scale)
    jax.block_until_ready((ctx, attn))
    ctx_r, attn_r = _reference(q, k, v, scale=scale)
    assert jnp.allclose(ctx, ctx_r, atol=5e-3, rtol=5e-3), "ctx mismatch"
    assert jnp.allclose(attn, attn_r, atol=5e-3, rtol=5e-3), "attn mismatch"

    # Path 2: boolean attn_mask (masked_fill with -inf before softmax).
    mask = jax.random.bernoulli(km, 0.3, (B, Lq, Lk))
    mask = mask.at[:, :, 0].set(False)  # keep >=1 unmasked key per row (avoid NaN rows)
    ctx_m, attn_m = scaled_dot_product_attention(q, k, v, scale=scale, attn_mask=mask)
    jax.block_until_ready((ctx_m, attn_m))
    ctx_mr, attn_mr = _reference(q, k, v, scale=scale, attn_mask=mask)
    assert jnp.allclose(ctx_m, ctx_mr, atol=5e-3, rtol=5e-3), "masked ctx mismatch"
    assert jnp.allclose(attn_m, attn_mr, atol=5e-3, rtol=5e-3), "masked attn mismatch"

    # TODO(synk): dropout_rate > 0.0 (stateful nn.Dropout) is not implemented; the
    #             module default dropout_rate=0.0 is an identity and is reproduced.
    print("KERNEL_OK")
</pallas_src>

<mosaic_0001>
module attributes {stable_mosaic.version = 11 : i64} {
  func.func @_sdpa_kernel(%arg0: i32, %arg1: i32, %arg2: memref<1x8x128xf32, #tpu.memory_space<vmem>>, %arg3: memref<1x128x128xf32, #tpu.memory_space<vmem>>, %arg4: memref<1x128x128xf32, #tpu.memory_space<vmem>>, %arg5: memref<1x8x128xf32, #tpu.memory_space<vmem>>, %arg6: memref<1x8x128xf32, #tpu.memory_space<vmem>>) attributes {dimension_semantics = [#tpu.dimension_semantics<parallel>, #tpu.dimension_semantics<parallel>], iteration_bounds = array<i64: 2, 1>, scalar_prefetch = 0 : i64, scratch_operands = 0 : i64, tpu.core_type = #tpu.core_type<tc>, window_params = [{transform_indices = @transform_0, window_bounds = array<i64: 1, 8, 128>}, {transform_indices = @transform_1, window_bounds = array<i64: 1, 128, 128>}, {transform_indices = @transform_2, window_bounds = array<i64: 1, 128, 128>}, {transform_indices = @transform_3, window_bounds = array<i64: 1, 8, 128>}, {transform_indices = @transform_4, window_bounds = array<i64: 1, 8, 128>}]} {
    %c0 = arith.constant 0 : index
    %c0_0 = arith.constant 0 : index
    %c0_1 = arith.constant 0 : index
    %0 = vector.load %arg2[%c0, %c0_0, %c0_1] : memref<1x8x128xf32, #tpu.memory_space<vmem>>, vector<1x8x128xf32>
    %1 = vector.shape_cast %0 : vector<1x8x128xf32> to vector<8x128xf32>
    %c0_2 = arith.constant 0 : index
    %c0_3 = arith.constant 0 : index
    %c0_4 = arith.constant 0 : index
    %2 = vector.load %arg3[%c0_2, %c0_3, %c0_4] : memref<1x128x128xf32, #tpu.memory_space<vmem>>, vector<1x128x128xf32>
    %3 = vector.shape_cast %2 : vector<1x128x128xf32> to vector<128x128xf32>
    %c0_5 = arith.constant 0 : index
    %c0_6 = arith.constant 0 : index
    %c0_7 = arith.constant 0 : index
    %4 = vector.load %arg4[%c0_5, %c0_6, %c0_7] : memref<1x128x128xf32, #tpu.memory_space<vmem>>, vector<1x128x128xf32>
    %5 = vector.shape_cast %4 : vector<1x128x128xf32> to vector<128x128xf32>
    %cst = arith.constant 0.176776692 : f32
    %6 = vector.broadcast %cst : f32 to vector<8x128xf32>
    %7 = arith.mulf %1, %6 : vector<8x128xf32>
    %cst_8 = arith.constant dense<0.000000e+00> : vector<8x128xf32>
    %8 = tpu.matmul %7, %3, %cst_8 {dimension_numbers = #tpu.dot_dimension_numbers<[1], [1], [0], [0], [0, 0, 1, 0], [], []>} : vector<8x128xf32>, vector<128x128xf32>, vector<8x128xf32> -> vector<8x128xf32>
    %9 = tpu.iota {dimensions = array<i32: 1>} : vector<8x128xi32>
    %c8_i32 = arith.constant 8 : i32
    %10 = vector.broadcast %c8_i32 : i32 to vector<8x128xi32>
    %11 = arith.cmpi slt, %9, %10 : vector<8x128xi32>
    %cst_9 = arith.constant 0xFF800000 : f32
    %12 = vector.broadcast %cst_9 : f32 to vector<8x128xf32>
    %13 = arith.select %11, %8, %12 : vector<8x128xi1>, vector<8x128xf32>
    %cst_10 = arith.constant dense<0xFF800000> : vector<8xf32>
    %14 = vector.multi_reduction <maximumf>, %13, %cst_10 [1] : vector<8x128xf32> to vector<8xf32>
    %15 = vector.shape_cast %14 : vector<8xf32> to vector<8x1xf32>
    %16 = vector.broadcast %15 : vector<8x1xf32> to vector<8x128xf32>
    %17 = arith.subf %13, %16 : vector<8x128xf32>
    %18 = math.exp %17 : vector<8x128xf32>
    %cst_11 = arith.constant dense<0.000000e+00> : vector<8xf32>
    %19 = vector.multi_reduction <add>, %18, %cst_11 [1] : vector<8x128xf32> to vector<8xf32>
    %20 = vector.shape_cast %19 : vector<8xf32> to vector<8x1xf32>
    %21 = tpu.reciprocal %20 {approx = true} : vector<8x1xf32> -> vector<8x1xf32>
    %22 = vector.broadcast %21 : vector<8x1xf32> to vector<8x128xf32>
    %23 = arith.mulf %18, %22 : vector<8x128xf32>
    %cst_12 = arith.constant dense<0.000000e+00> : vector<8x128xf32>
    %24 = tpu.matmul %23, %5, %cst_12 {dimension_numbers = #tpu.dot_dimension_numbers<[1], [0], [0], [1], [0, 0, 1, 1], [], []>} : vector<8x128xf32>, vector<128x128xf32>, vector<8x128xf32> -> vector<8x128xf32>
    %c0_13 = arith.constant 0 : index
    %c0_14 = arith.constant 0 : index
    %c0_15 = arith.constant 0 : index
    %25 = vector.load %arg5[%c0_13, %c0_14, %c0_15] : memref<1x8x128xf32, #tpu.memory_space<vmem>>, vector<1x8x128xf32>
    %26 = vector.shape_cast %25 : vector<1x8x128xf32> to vector<8x128xf32>
    %27 = vector.shape_cast %24 : vector<8x128xf32> to vector<1x8x128xf32>
    tpu.vector_store %arg5[%c0_13, %c0_14, %c0_15], %27 {strides = array<i32>} : memref<1x8x128xf32, #tpu.memory_space<vmem>>, vector<1x8x128xf32>,
    %c0_16 = arith.constant 0 : index
    %c0_17 = arith.constant 0 : index
    %c0_18 = arith.constant 0 : index
    %28 = vector.load %arg6[%c0_16, %c0_17, %c0_18] : memref<1x8x128xf32, #tpu.memory_space<vmem>>, vector<1x8x128xf32>
    %29 = vector.shape_cast %28 : vector<1x8x128xf32> to vector<8x128xf32>
    %30 = vector.shape_cast %23 : vector<8x128xf32> to vector<1x8x128xf32>
    tpu.vector_store %arg6[%c0_16, %c0_17, %c0_18], %30 {strides = array<i32>} : memref<1x8x128xf32, #tpu.memory_space<vmem>>, vector<1x8x128xf32>,
    return
  }
  func.func @transform_0(%arg0: i32, %arg1: i32) -> (i32, i32, i32) {
    %c0_i32 = arith.constant 0 : i32
    %c0_i32_0 = arith.constant 0 : i32
    return %arg0, %arg1, %c0_i32 : i32, i32, i32
  }
  func.func @transform_1(%arg0: i32, %arg1: i32) -> (i32, i32, i32) {
    %c0_i32 = arith.constant 0 : i32
    %c0_i32_0 = arith.constant 0 : i32
    %c0_i32_1 = arith.constant 0 : i32
    return %arg0, %c0_i32, %c0_i32_0 : i32, i32, i32
  }
  func.func @transform_2(%arg0: i32, %arg1: i32) -> (i32, i32, i32) {
    %c0_i32 = arith.constant 0 : i32
    %c0_i32_0 = arith.constant 0 : i32
    %c0_i32_1 = arith.constant 0 : i32
    return %arg0, %c0_i32, %c0_i32_0 : i32, i32, i32
  }
  func.func @transform_3(%arg0: i32, %arg1: i32) -> (i32, i32, i32) {
    %c0_i32 = arith.constant 0 : i32
    %c0_i32_0 = arith.constant 0 : i32
    return %arg0, %arg1, %c0_i32 : i32, i32, i32
  }
  func.func @transform_4(%arg0: i32, %arg1: i32) -> (i32, i32, i32) {
    %c0_i32 = arith.constant 0 : i32
    %c0_i32_0 = arith.constant 0 : i32
    return %arg0, %arg1, %c0_i32 : i32, i32, i32
  }
}

</mosaic_0001>

<bundles_post_ra>
// kernel: tpu_custom_call.1
= control target key start
LH: loop header
LB: loop body
LE: loop exit
PB: predicated region body
PF: predicated region fallthrough
CT: control target
= control target key end

     0   :  { %s1169_s0 = inlined_call_operand.hbm [shape: f32[2,8,128], index: 0, kind: input, shape index: {}]   ;;  %s1170_s1 = inlined_call_operand.hbm [shape: f32[2,128,128], index: 1, kind: input, shape index: {}]   ;;  %s1171_s2 = inlined_call_operand.hbm [shape: f32[2,128,128], index: 2, kind: input, shape index: {}]   ;;  %s1172_s3 = inlined_call_operand.hbm [shape: f32[2,8,128], index: 3, kind: output, shape index: {0}]   ;;  %s1173_s4 = inlined_call_operand.hbm [shape: f32[2,8,128], index: 4, kind: output, shape index: {1}]  }
   0x1   :  { %1177 = sst [smem:[#allocation19_spill]] %s1170_s1 }
   0x2   :  { %10 = vsyncpa [#allocation3], 0 }
   0x3   :  { %12 = vsyncpa [#allocation3 + $0x1], 0 }
   0x4   :  { %13 = vsyncpa [#allocation6], 0 }
   0x5   :  { %15 = vsyncpa [#allocation6 + $0x1], 0 }
   0x6   :  { %16 = vsyncpa [#allocation4], 0 }
   0x7   :  { %18 = vsyncpa [#allocation4 + $0x1], 0 }
   0x8   :  { %19 = vsyncpa [#allocation10], 0 }
   0x9   :  { %21 = vsyncpa [#allocation10 + $0x1], 0  ;;  %s955_s15 = smov 0   ;;  %s957_s16 = smov 0  }
   0xa   :  { %s959_s17 = smov 0   ;;  %s961_s18 = smov 0  }
   0xb   :  { %s963_s19 = smov 0   ;;  %s965_s20 = smov 0  }
   0xc LB: > { %1178 = sst [smem:[#allocation15_spill]] %s914_s17  ;;  %s986_s21 = sadd.s32 4294967295, %s926_s20   ;;  %s926_s20 = sphi %s965_s20, %s27_s20   ;;  %s922_s19 = sphi %s963_s19, %s1195_s19   ;;  %s918_s18 = sphi %s961_s18, %s1194_s18   ;;  %s914_s17 = sphi %s959_s17, %s1190_s17   ;;  %s910_s16 = sphi %s957_s16, %s1193_s16   ;;  %s906_s15 = sphi %s955_s15, %s1192_s15  }
   0xd   : > { %s610_s22 = sadd.s32 4294967294, %s926_s20   ;;  %s39_s23 = sadd.s32 1, %s922_s19 }
   0xe   : > { %s48_s24 = sadd.s32 1, %s914_s17  ;;  %p41_p0 = scmp.ge.s32.totalorder %s39_s23, 2 }
   0xf   : > { %p55_p1 = scmp.ne.s32.totalorder %s914_s17, %s910_s16  ;;  %p56_p2 = scmp.eq.s32.totalorder %s926_s20, 0 }
  0x10   : > { %p61_p3 = scmp.ne.s32.totalorder %s910_s16, %s906_s15  ;;  %s1197_s23 = smov (%p41_p0, %s39_s23), 0 }
  0x11   : > { %1179 = sst [smem:[#allocation16_spill]] %s1197_s23  ;;  %p998_p4 = por %p56_p2, %p55_p1 }
  0x12   : > { %p62_p5 = scmp.eq.s32.totalorder %s986_s21, 0  ;;  %s43_s26 = ssub.s32 %s922_s19, %s1197_s23 }
  0x13   : > { %p139_p6 = scmp.eq.s32.totalorder %s986_s21, 1  ;;  %p46_p7 = scmp.eq.s32.totalorder %s43_s26, 0 }
  0x14   : > { %p1006_p8 = por %p62_p5, %p61_p3  ;;  %p145_p10 = scmp.eq.s32.totalorder %s610_s22, 1 }
  0x15   : > { %p1010_p9 = por %p139_p6, %p55_p1  ;;  %p612_p12 = scmp.ge.s32.totalorder %s926_s20, 2 }
  0x16   : > { %s1015_s29 = scalar_select %p46_p7, %s914_s17, %s48_s24  }
  0x17   : > { %p1017_p11 = por %p145_p10, %p61_p3  ;;  %p662_p13 = scmp.lt.s32.totalorder %s926_s20, 2 }
  0x18   : > { %1183 = sst [smem:[#allocation17_spill]] %s1015_s29  ;;  %s1024_s5 = sand.u32 1, %s914_s17  }
  0x19   : > { %s1184_s30 = scalar_select %p1017_p11, 1, 0 }
  0x1a   : > { %s213_s6 = sand.u32 1, %s926_s20   ;;  %s615_s7 = sshll.u32 %s1024_s5, 7 }
  0x1b   : > { %1185 = sst [smem:[#allocation18_spill]] %s1184_s30  ;;  %p1030_p0 = pnand %p662_p13, %p998_p4 }
  0x1c   : > { %s633_s9 = sshll.u32 %s922_s19, 7  ;;  %s1187_s1 = sld [smem:[#allocation19_spill]] }
  0x1d   : > { %s217_s14 = scalar_lea.vmem [#allocation5], %s615_s7  ;;  %s214_s24 = scalar_lea.sflag [#allocation6], %s213_s6 }
  0x1e   : > { %s225_s22 = sshll.u32 %s217_s14, 4  ;;  %s928_s25 = smov 128   ;;  %s226_s22 = int_to_ptr.vmem [resolvable:$true] %s225_s22 }
  0x1f   : > { %s929_s26 = smov 8   ;;  %s244_s17 = scalar_lea.hbm %s1171_s2, %s633_s9 }
  0x20   : > { %s245_s10 = sshll.u32 %s244_s17, 4  ;;  %s239_s11 = scalar_lea.vmem [#allocation7], %s615_s7  ;;  %s246_s10 = int_to_ptr.hbm [resolvable:$true] %s245_s10 }
  0x21   : > { %p621_p1 = scmp.ge.s32.totalorder %s926_s20, 1  ;;  %p255_p2 = scmp.lt.s32.totalorder %s926_s20, 3 }
  0x22   : > { %s222_s12 = scalar_lea.hbm %s1187_s1, %s633_s9  ;;  %s613_s6 = sshll.u32 %s1024_s5, 3 }
  0x23   : > { %s223_s13 = sshll.u32 %s222_s12, 4  ;;  %s247_s12 = sshll.u32 %s239_s11, 4  ;;  %s224_s13 = int_to_ptr.hbm [resolvable:$true] %s223_s13  ;;  %s248_s12 = int_to_ptr.vmem [resolvable:$true] %s247_s12 }
  0x24   : > { %651 = dma.hbm_to_vmem [thread:$0]  (!%p1030_p0), %s224_s13, 2048, %s226_s22, %s214_s24, %s928_s25, %s928_s25, %s929_s26  }
  0x25   : > { %p256_p3 = pnand %p621_p1, %p255_p2  ;;  %s614_s14 = sshll.u32 %s922_s19, 3 }
  0x26   : > { %s202_s13 = scalar_lea.hbm %s1169_s0, %s614_s14  ;;  %s197_s23 = scalar_lea.vmem [#allocation2], %s613_s6 }
  0x27   : > { %s204_s22 = sshll.u32 %s202_s13, 4  ;;  %s206_s29 = sshll.u32 %s197_s23, 4  ;;  %s205_s22 = int_to_ptr.hbm [resolvable:$true] %s204_s22  ;;  %s207_s29 = int_to_ptr.vmem [resolvable:$true] %s206_s29 }
  0x28   : > { %s194_s17 = scalar_lea.sflag [#allocation3], %s1024_s5  ;;  %259 = sbr.rel (%p256_p3) target bundleno = 622 (0x26e), region = 32 }
  0x29   : > { %648 = dma.hbm_to_vmem [thread:$0]  (!%p1030_p0), %s205_s22, 128, %s207_s29, %s194_s17  }
  0x2a   : > { %654 = dma.hbm_to_vmem [thread:$0]  (!%p1030_p0), %s246_s10, 2048, %s248_s12, %s214_s24, %s928_s25, %s928_s25, %s929_s26  }
  0x2b   : > { %s1056_s7 = sand.u32 (!%p256_p3), 1, %s910_s16  }
  0x2c   : > { %s1059_s9 = sshll.u32 (!%p256_p3), %s1056_s7, 3  ;;  %s262_s1 = scalar_lea.sflag (!%p256_p3), [#allocation3], %s1056_s7 }
  0x2d   : > { %s265_s30 = scalar_lea.vmem [#allocation2], %s1059_s9 }
  0x2e   : > { %889 = dma.done.wait (%p1006_p8), %s262_s1, 128  }
  0x2f   : > { %891 = vsyncadd (%p1006_p8), %s262_s1, 4294967168  ;;  %s271_s5 = sand.u32 1, %s986_s21   ;;  %s623_s8 = sshll.u32 %s1056_s7, 7 }
  0x30   : > { %s272_s24 = scalar_lea.sflag [#allocation6], %s271_s5  ;;  %s1071_s25 = scalar_lea.vmem [#allocation5], %s623_s8 }
  0x31   : > { %893 = dma.done.wait (%p1006_p8), %s272_s24, 4096  }
  0x32   : > { %895 = vsyncadd (%p1006_p8), %s272_s24, 4294963200  ;;  %v342_v0 = vld [vmem:[%s1071_s25 + $0x78] sm:$0xff]  ;;  %v341_v1 = vld [vmem:[%s1071_s25 + $0x70] sm:$0xff]  ;;  %v380_v18 = vlaneseq  ;;  %s1097_s21 = scalar_lea.vmem [#allocation7], %s623_s8  ;;  %s629_s27 = sshll.u32 %s918_s18, 3 }
  0x33   : > { %360 = vmatpush.xpose.msra.mxu0 %v342_v0  ;;  %v340_v2 = vld [vmem:[%s1071_s25 + $0x68] sm:$0xff]  ;;  %v339_v3 = vld [vmem:[%s1071_s25 + $0x60] sm:$0xff]  ;;  %v338_v4 = vld [vmem:[%s1071_s25 + $0x58] sm:$0xff]  ;;  %s447_s11 = scalar_lea.hbm %s1173_s4, %s629_s27  ;;  %s325_s12 = scalar_lea.vmem [#allocation9], %s1059_s9 }
  0x34   : > { %v337_v5 = vld [vmem:[%s1071_s25 + $0x50] sm:$0xff]  ;;  %v336_v6 = vld [vmem:[%s1071_s25 + $0x48] sm:$0xff]  ;;  %v335_v7 = vld [vmem:[%s1071_s25 + $0x40] sm:$0xff]  ;;  %v381_v19 = vand.u32 127, %v380_v18  ;;  %s449_s6 = sshll.u32 %s325_s12, 4  ;;  %s451_s14 = sshll.u32 %s447_s11, 4  ;;  %s450_s6 = int_to_ptr.vmem [resolvable:$true] %s449_s6  ;;  %s452_s14 = int_to_ptr.hbm [resolvable:$true] %s451_s14 }
  0x35   : > { %v334_v8 = vld [vmem:[%s1071_s25 + $0x38] sm:$0xff]  ;;  %v333_v9 = vld [vmem:[%s1071_s25 + $0x30] sm:$0xff]  ;;  %v332_v10 = vld [vmem:[%s1071_s25 + $0x28] sm:$0xff]  ;;  %s421_s13 = scalar_lea.sflag [#allocation10], %s1056_s7  ;;  %s822_s22 = sshra.s32 %s452_s14, 4  ;;  %s823_s22 = int_to_ptr.hbm [resolvable:$true] %s822_s22 }
  0x36   : > { %v331_v11 = vld [vmem:[%s1071_s25 + $0x20] sm:$0xff]  ;;  %v330_v12 = vld [vmem:[%s1071_s25 + $0x18] sm:$0xff]  ;;  %v329_v13 = vld [vmem:[%s1071_s25 + $0x10] sm:$0xff]  ;;  %vm382_vm0 = vcmp.lt.s32.totalorder %v381_v19, 8  ;;  %s824_s23 = scalar_lea.hbm %s823_s22, 8  ;;  %s828_s17 = scalar_lea.hbm %s1173_s4, 16 }
  0x37   : > { %361 = vmatpush.xpose.msra.mxu0 %v341_v1  ;;  %v328_v14 = vld [vmem:[%s1071_s25 + $0x8] sm:$0xff]  ;;  %v326_v15 = vld [vmem:[%s265_s30] sm:$0xff]  ;;  %v327_v16 = vld [vmem:[%s1071_s25] sm:$0xff]  ;;  %p825_p4 = scmp.ne.s32.totalorder %s823_s22, %s824_s23  ;;  %p829_p7 = scmp.lt.s32.totalorder %s823_s22, %s1173_s4 }
  0x38   : > { %v359_v17 = vmul.f32 0.17677669, %v326_v15  ;;  %v358_v22 = vld [vmem:[%s1097_s21 + $0x78] sm:$0xff]  ;;  %v357_v23 = vld [vmem:[%s1097_s21 + $0x70] sm:$0xff]  ;;  %v356_v24 = vld [vmem:[%s1097_s21 + $0x68] sm:$0xff]  ;;  %p830_p8 = scmp.lt.s32.totalorder %s828_s17, %s824_s23 }
  0x39   : > { %393 = vmatpush.msra.mxu1 %v358_v22  ;;  %v355_v25 = vld [vmem:[%s1097_s21 + $0x60] sm:$0xff]  ;;  %v354_v26 = vld [vmem:[%s1097_s21 + $0x58] sm:$0xff]  ;;  %v353_v27 = vld [vmem:[%s1097_s21 + $0x50] sm:$0xff]  ;;  %p826_p5 = pnand %p825_p4, %p1010_p9 }
  0x3a   : > { %v352_v28 = vld [vmem:[%s1097_s21 + $0x48] sm:$0xff]  ;;  %v351_v29 = vld [vmem:[%s1097_s21 + $0x40] sm:$0xff]  ;;  %v350_v30 = vld [vmem:[%s1097_s21 + $0x38] sm:$0xff]  ;;  %p831_p10 = por %p830_p8, %p829_p7 }
  0x3b   : > { %362 = vmatpush.xpose.msra.mxu0 %v340_v2  ;;  %394 = vmatpush.msra.mxu1 %v357_v23  ;;  %v349_v31 = vld [vmem:[%s1097_s21 + $0x30] sm:$0xff]  ;;  %v348_v32 = vld [vmem:[%s1097_s21 + $0x28] sm:$0xff]  ;;  %v347_v37 = vld [vmem:[%s1097_s21 + $0x20] sm:$0xff]  ;;  %p827_p6 = pneg %p826_p5 }
  0x3c   : > { %v346_v38 = vld [vmem:[%s1097_s21 + $0x18] sm:$0xff]  ;;  %v345_v39 = vld [vmem:[%s1097_s21 + $0x10] sm:$0xff]  ;;  %v344_v40 = vld [vmem:[%s1097_s21 + $0x8] sm:$0xff] }
  0x3d   : > { %395 = vmatpush.msra.mxu1 %v356_v24  ;;  %v343_v41 = vld [vmem:[%s1097_s21] sm:$0xff]  ;;  %p832_p13 = pnand %p831_p10, %p827_p6 }
  0x3f   : > { %363 = vmatpush.xpose.msra.mxu0 %v339_v3  ;;  %396 = vmatpush.msra.mxu1 %v355_v25 }
  0x41   : > { %397 = vmatpush.msra.mxu1 %v354_v26 }
  0x43   : > { %364 = vmatpush.xpose.msra.mxu0 %v338_v4  ;;  %398 = vmatpush.msra.mxu1 %v353_v27 }
  0x45   : > { %399 = vmatpush.msra.mxu1 %v352_v28 }
  0x47   : > { %365 = vmatpush.xpose.msra.mxu0 %v337_v5  ;;  %400 = vmatpush.msra.mxu1 %v351_v29 }
  0x49   : > { %401 = vmatpush.msra.mxu1 %v350_v30 }
  0x4b   : > { %366 = vmatpush.xpose.msra.mxu0 %v336_v6  ;;  %402 = vmatpush.msra.mxu1 %v349_v31 }
  0x4d   : > { %403 = vmatpush.msra.mxu1 %v348_v32 }
  0x4f   : > { %367 = vmatpush.xpose.msra.mxu0 %v335_v7  ;;  %404 = vmatpush.msra.mxu1 %v347_v37 }
  0x51   : > { %405 = vmatpush.msra.mxu1 %v346_v38 }
  0x53   : > { %368 = vmatpush.xpose.msra.mxu0 %v334_v8  ;;  %406 = vmatpush.msra.mxu1 %v345_v39 }
  0x55   : > { %407 = vmatpush.msra.mxu1 %v344_v40 }
  0x57   : > { %369 = vmatpush.xpose.msra.mxu0 %v333_v9  ;;  %408 = vmatpush.msra.mxu1 %v343_v41 }
  0x5b   : > { %370 = vmatpush.xpose.msra.mxu0 %v332_v10 }
  0x5f   : > { %371 = vmatpush.xpose.msra.mxu0 %v331_v11 }
  0x63   : > { %372 = vmatpush.xpose.msra.mxu0 %v330_v12 }
  0x67   : > { %373 = vmatpush.xpose.msra.mxu0 %v329_v13 }
  0x6b   : > { %374 = vmatpush.xpose.msra.mxu0 %v328_v14 }
  0x6f   : > { %375 = vmatpush.xpose.msra.mxu0 %v327_v16 }
  0x72   : > { %376 = vmatmul.f32.vlgmr.msra.gmra.mxu0 %v359_v17 }
  0xef   : > { %v377_v20 = vpop.f32.mrf.mxu0 }
  0xf0   : > { %v383_v21 = vsel %vm382_vm0, %v377_v20, -inf }
  0xf1   : > { %384 = vmax.xlane.f32.xlu0 %v383_v21 }
 0x164   : > { %v385_v33 = vpop.xlane.xlu0 %384 }
 0x165   : > { %v386_v34 = vsub.f32 %v383_v21, %v385_v33 }
 0x167   : > { %v387_v35 = vmul.f32 1.442695, %v386_v34 }
 0x169   : > { %714 = vpow2.f32 %v387_v35 }
 0x16f   : > { %v715_v36 = vpop.eup %714 }
 0x170   : > { %389 = vadd.xlane.f32.xlu0 %v715_v36 }
 0x1e3   : > { %v390_v42 = vpop.xlane.xlu0 %389 }
 0x1e4   : > { %716 = vrcp.f32 %v390_v42 }
 0x1ea   : > { %v717_v43 = vpop.eup %716 }
 0x1eb   : > { %v392_v44 = vmul.f32 %v717_v43, %v715_v36 }
 0x1ed   : > { %409 = vmatmul.f32.vlgmr.msra.gmra.mxu1 %v392_v44  ;;  %414 = vst [vmem:[%s325_s12] sm:$0xff] %v392_v44 }
 0x1ee   : > { %835 = shalt.err (!%p832_p13)
}
 0x1ef   : > { %642 = dma.vmem_to_hbm [thread:$0]  (%p1010_p9), %s450_s6, 128, %s452_s14, %s421_s13  }
 0x1f0   : > { %s432_s24 = scalar_lea.hbm %s1172_s3, %s629_s27  ;;  %s318_s25 = scalar_lea.vmem [#allocation8], %s1059_s9 }
 0x1f1   : > { %s434_s21 = sshll.u32 %s318_s25, 4  ;;  %s436_s26 = sshll.u32 %s432_s24, 4  ;;  %s435_s21 = int_to_ptr.vmem [resolvable:$true] %s434_s21  ;;  %s437_s26 = int_to_ptr.hbm [resolvable:$true] %s436_s26 }
 0x1f2   : > { %s416_s10 = scalar_lea.sflag [#allocation4], %s1056_s7  ;;  %s850_s11 = sshra.s32 %s437_s26, 4  ;;  %s851_s11 = int_to_ptr.hbm [resolvable:$true] %s850_s11 }
 0x1f3   : > { %s852_s12 = scalar_lea.hbm %s851_s11, 8  ;;  %s856_s13 = scalar_lea.hbm %s1172_s3, 16 }
 0x1f4   : > { %p853_p0 = scmp.ne.s32.totalorder %s851_s11, %s852_s12  ;;  %p857_p3 = scmp.lt.s32.totalorder %s851_s11, %s1172_s3 }
 0x1f5   : > { %p858_p4 = scmp.lt.s32.totalorder %s856_s13, %s852_s12 }
 0x1f6   : > { %p854_p1 = pnand %p853_p0, %p1010_p9 }
 0x1f7   : > { %p859_p5 = por %p858_p4, %p857_p3 }
 0x1f8   : > { %p855_p2 = pneg %p854_p1 }
 0x1fa   : > { %p860_p6 = pnand %p859_p5, %p855_p2 }
 0x26a   : > { %v410_v45 = vpop.f32.mrf.mxu1 }
 0x26b   : > { %413 = vst [vmem:[%s318_s25] sm:$0xff] %v410_v45 }
 0x26c   : > { %863 = shalt.err (!%p860_p6)
}
 0x26d   : > { %641 = dma.vmem_to_hbm [thread:$0]  (%p1010_p9), %s435_s21, 128, %s437_s26, %s416_s10  }
 0x26e PF: > { %s463_s22 = sand.u32 1, %s906_s15   ;;  %p656_p7 = pnand %p612_p12, %p1017_p11 }
 0x26f   : > { %s464_s23 = scalar_lea.sflag [#allocation4], %s463_s22 }
 0x270   : > { %p657_p8 = pneg %p656_p7 }
 0x272   : > { %897 = dma.done.wait (%p657_p8), %s464_s23, 128  }
 0x273   : > { %899 = vsyncadd (%p657_p8), %s464_s23, 4294967168  ;;  %s474_s18 = scalar_lea.sflag [#allocation10], %s463_s22 }
 0x274   : > { %901 = dma.done.wait (%p657_p8), %s474_s18, 128  }
 0x275   : > { %903 = vsyncadd (%p657_p8), %s474_s18, 4294967168  ;;  %s27_s20 = sadd.s32 1, %s926_s20   ;;  %s1189_s28 = sld [smem:[#allocation15_spill]] }
 0x276   : > { %p24_p10 = scmp.ge.s32.totalorder %s27_s20, 4   ;;  %s1190_s17 = sld [smem:[#allocation17_spill]] }
 0x277   : > { %s1191_s29 = sld [smem:[#allocation16_spill]]  ;;  %s1192_s15 = smov %s910_s16 }
 0x278   : > { %s1194_s18 = smov %s922_s19 }
 0x279   :  { %26 = sbr.rel (!%p24_p10) target bundleno = 12 (0xc), region = 118 }
 0x27b   : > { %s1193_s16 = smov %s1189_s28 }
 0x27d   : > { %s1195_s19 = smov %s1191_s29 }
 0x27e   :  { %480 = vsyncpa [#allocation3], 1 }
 0x27f   :  { %482 = vsyncpa [#allocation3 + $0x1], 1 }
 0x280   :  { %483 = vsyncpa [#allocation6], 1 }
 0x281   :  { %485 = vsyncpa [#allocation6 + $0x1], 1 }
 0x282   :  { %486 = vsyncpa [#allocation4], 1 }
 0x283   :  { %488 = vsyncpa [#allocation4 + $0x1], 1 }
 0x284   :  { %489 = vsyncpa [#allocation10], 1 }
 0x285   :  { %491 = vsyncpa [#allocation10 + $0x1], 1 }

</bundles_post_ra>
